<compile_context>
chip_gen: v7x
topology: tpu7x:2x2x1
jax: 0.10.0
libtpu: 0.0.40
codegen_flags: <defaults>
</compile_context>

<pallas_src>
import functools

import jax
import jax.numpy as jnp
from jax.experimental import pallas as pl
from jax.experimental.pallas import tpu as pltpu

EPS = 1e-5       # nn.BatchNorm2d default eps
_LANE = 128
_SUBLANE = 8


def _round_up(a, b):
    return (a + b - 1) // b * b


def _vmem_cap_bytes():
    try:
        cap = int(getattr(pltpu.get_tpu_info(), "vmem_capacity_bytes", 0) or 0)
    except Exception:
        cap = 0
    return cap if cap > 0 else (64 << 20)   # conservative default: v7x per-TC VMEM


def _c_tile_candidates(C):
    # Legal second-to-last block dims: multiples of 8 that divide C, or the full C.
    cands = [t for t in range(_SUBLANE, C, _SUBLANE) if C % t == 0]
    cands.append(C)
    return cands


# --------------------------------------------------------------------------------------
# Single-pass kernel: stats + fused normalize/affine for one channel block.
# --------------------------------------------------------------------------------------
def _cond_bn_single_pass_kernel(x_ref, gb_ref, o_ref, acc_ref, *, inv_n, n_pad):
    """x_ref: (B, CT, HWp); gb_ref: (B, CT, 2) f32; acc_ref: (CT, HWp) f32 scratch."""
    B = x_ref.shape[0]

    # ---- pass 1: per-channel sum (batch reduced first on the VPU, one lane reduce) ----
    acc_ref[...] = jnp.zeros_like(acc_ref)

    def _sum_body(b, carry):
        acc_ref[...] += x_ref[b].astype(jnp.float32)
        return carry

    jax.lax.fori_loop(0, B, _sum_body, 0)
    mean = jnp.sum(acc_ref[...], axis=-1, keepdims=True) * inv_n              # (CT, 1)

    # ---- pass 2: centered sum of squares (robust two-pass variance, f32) ----
    acc_ref[...] = jnp.zeros_like(acc_ref)

    def _sq_body(b, carry):
        d = x_ref[b].astype(jnp.float32) - mean
        acc_ref[...] += d * d
        return carry

    jax.lax.fori_loop(0, B, _sq_body, 0)
    css = jnp.sum(acc_ref[...], axis=-1, keepdims=True)                        # (CT, 1)
    if n_pad:
        # Zero-padded lanes each contribute mean^2 to the centered sum; remove exactly.
        css = css - jnp.float32(n_pad) * (mean * mean)
    var = jnp.maximum(css * inv_n, 0.0)                                        # biased var
    inv_std = jax.lax.rsqrt(var + EPS)

    # ---- pass 3: fused normalize + conditional affine, streaming over batch rows ----
    def _out_body(b, carry):
        gb = gb_ref[b]                                        # (CT, 2) f32: gamma, beta
        scale = (1.0 + gb[:, 0:1]) * inv_std                  # (CT, 1)
        shift = gb[:, 1:2] - mean * scale                     # (CT, 1)
        o_ref[b] = (x_ref[b].astype(jnp.float32) * scale + shift).astype(o_ref.dtype)
        return carry

    jax.lax.fori_loop(0, B, _out_body, 0)


# --------------------------------------------------------------------------------------
# Two-pass path kernels: stats accumulation (grid over C x HW) + normalize/apply.
# --------------------------------------------------------------------------------------
def _bn_stats_kernel(x_ref, stat_ref, acc_ref):
    """x_ref: (B, CT, HWT); stat_ref: (CT, 2) f32 output resident across the HW axis."""
    @pl.when(pl.program_id(1) == 0)
    def _():
        stat_ref[...] = jnp.zeros_like(stat_ref)

    B = x_ref.shape[0]

    acc_ref[...] = jnp.zeros_like(acc_ref)

    def _sum_body(b, carry):
        acc_ref[...] += x_ref[b].astype(jnp.float32)
        return carry

    jax.lax.fori_loop(0, B, _sum_body, 0)
    s = jnp.sum(acc_ref[...], axis=-1, keepdims=True)                          # (CT, 1)

    acc_ref[...] = jnp.zeros_like(acc_ref)

    def _sq_body(b, carry):
        xb = x_ref[b].astype(jnp.float32)
        acc_ref[...] += xb * xb
        return carry

    jax.lax.fori_loop(0, B, _sq_body, 0)
    ss = jnp.sum(acc_ref[...], axis=-1, keepdims=True)                         # (CT, 1)

    stat_ref[...] += jnp.concatenate([s, ss], axis=-1)                         # (CT, 2)


def _bn_apply_kernel(x_ref, ssh_ref, o_ref):
    """x_ref: (B, CT, HWT); ssh_ref: (B, CT, 2) f32 holding (scale, shift)."""
    B = x_ref.shape[0]

    def _body(b, carry):
        ssh = ssh_ref[b]                                                       # (CT, 2)
        o_ref[b] = (x_ref[b].astype(jnp.float32) * ssh[:, 0:1]
                    + ssh[:, 1:2]).astype(o_ref.dtype)
        return carry

    jax.lax.fori_loop(0, B, _body, 0)


# --------------------------------------------------------------------------------------
# Tiling plans (explicit VMEM accounting, moderate blocks, >= 2 grid steps preferred).
# --------------------------------------------------------------------------------------
def _plan_single_pass(B, C, HWp, x_bytes, o_bytes, budget_bytes):
    target_in_block = 4 << 20     # mem-bound kernel: ~HBM roofline already at 512+ tiles

    def usage(ct):
        return (2 * B * ct * HWp * x_bytes        # double-buffered x blocks
                + 2 * B * ct * HWp * o_bytes      # double-buffered out blocks
                + 2 * B * ct * 2 * 4              # double-buffered fused gamma/beta blocks
                + ct * HWp * 4)                   # f32 accumulator scratch slab

    cands = _c_tile_candidates(C)
    fit = [t for t in cands
           if usage(t) <= budget_bytes and B * t * HWp * x_bytes <= target_in_block]
    if not fit:
        small = [t for t in cands if usage(t) <= budget_bytes]
        if not small:
            return None                                   # fall back to the two-pass path
        return small[0], usage(small[0])
    ct = fit[-1]
    if C // ct < 2:
        # Prefer >= 2 grid steps (DMA/compute overlap, v7x dual-TC) if blocks stay big.
        proper = [t for t in fit if t < C and B * t * HWp * x_bytes >= (256 << 10)]
        if proper:
            ct = proper[-1]
    return ct, usage(ct)


def _plan_two_pass(B, C, HW, x_bytes, o_bytes):
    target_in_block = 2 << 20
    ct = _c_tile_candidates(C)[0]                          # smallest legal channel tile
    hwt = (target_in_block // max(B * ct * x_bytes, 1)) // _LANE * _LANE
    hwt = max(_LANE, min(hwt, _round_up(HW, _LANE)))
    HWp = _round_up(HW, hwt)
    usage = max(
        2 * B * ct * hwt * x_bytes + 2 * ct * 2 * 4 + ct * hwt * 4,            # stats
        2 * B * ct * hwt * (x_bytes + o_bytes) + 2 * B * ct * 2 * 4,           # apply
    )
    return ct, hwt, HWp, usage


# --------------------------------------------------------------------------------------
# Wrapper.
# --------------------------------------------------------------------------------------
def conditional_batchnorm2d(x, y, w_gamma, w_beta, *, force_two_pass=False):
    """x: (B, C, H, W) NCHW; y: (B, E); w_gamma/w_beta: (C, E) PyTorch Linear weights."""
    # TODO(synk): PyTorch's BN also updates running_mean/running_var (momentum=0.001) in
    #             training mode; this kernel produces only the forward output.
    # TODO(synk): if the surrounding model can supply NHWC, a channels-on-lanes variant
    #             would remove all XLU lane reductions; not done here to avoid an extra
    #             HBM relayout pass for a mem-bound op.
    B, C, H, W = x.shape
    HW = H * W
    x_bytes = jnp.dtype(x.dtype).itemsize
    o_bytes = x_bytes

    # Hoisted, fused conditional-affine embeddings: one (B, E) x (E, 2C) dot in XLA.
    w_cat = jnp.concatenate([w_gamma, w_beta], axis=0)                    # (2C, E)
    gb = jnp.dot(y, w_cat.T, preferred_element_type=jnp.float32)          # (B, 2C) f32
    gamma, beta = gb[:, :C], gb[:, C:]

    cap = _vmem_cap_bytes()
    budget = int(cap * 0.7)          # single explicit headroom factor (no stacked fudges)

    x3 = x.reshape(B, C, HW)
    inv_n = 1.0 / float(B * HW)
    HWp_single = _round_up(HW, _LANE)

    plan = None if force_two_pass else _plan_single_pass(
        B, C, HWp_single, x_bytes, o_bytes, budget)

    if plan is not None:
        # ------------------------- single-pass path (1R + 1W HBM) -------------------------
        c_tile, usage = plan
        HWp = HWp_single
        if HWp != HW:
            # Lane-dense stores: zero-pad the spatial (lane) axis; the centered-variance
            # padding bias is corrected exactly inside the kernel.
            x3p = jnp.pad(x3, ((0, 0), (0, 0), (0, HWp - HW)))
        else:
            x3p = x3
        gb3 = jnp.stack([gamma, beta], axis=-1)                           # (B, C, 2) f32

        kernel = functools.partial(_cond_bn_single_pass_kernel,
                                   inv_n=inv_n, n_pad=B * (HWp - HW))
        vmem_limit = int(min(max(usage * 5 // 4 + (2 << 20), 16 << 20), cap))
        grid = (C // c_tile,)

        out3 = pl.pallas_call(
            kernel,
            out_shape=jax.ShapeDtypeStruct((B, C, HWp), x.dtype),
            grid_spec=pltpu.PrefetchScalarGridSpec(
                num_scalar_prefetch=0,
                grid=grid,
                in_specs=[
                    pl.BlockSpec((B, c_tile, HWp), lambda c: (0, c, 0)),
                    pl.BlockSpec((B, c_tile, 2), lambda c: (0, c, 0)),
                ],
                out_specs=pl.BlockSpec((B, c_tile, HWp), lambda c: (0, c, 0)),
                scratch_shapes=[pltpu.VMEM((c_tile, HWp), jnp.float32)],
            ),
            compiler_params=pltpu.CompilerParams(
                # Channel blocks are fully independent -> shard across TCs on v7x.
                # TODO(synk): if plain "parallel" does not dual-TC shard on v7x, switch
                #             this axis to pltpu.CORE_PARALLEL.
                dimension_semantics=("parallel",),
                vmem_limit_bytes=vmem_limit,
            ),
            cost_estimate=pl.CostEstimate(
                flops=6 * B * C * HWp,
                transcendentals=C,
                bytes_accessed=B * C * HWp * (x_bytes + o_bytes) + B * C * 2 * 4,
            ),
        )(x3p, gb3)
        out3 = out3[:, :, :HW] if HWp != HW else out3
        return out3.reshape(B, C, H, W)

    # ------------------------- two-pass path (2R + 1W HBM) -------------------------
    c_tile, hw_tile, HWp, usage = _plan_two_pass(B, C, HW, x_bytes, o_bytes)
    x3p = jnp.pad(x3, ((0, 0), (0, 0), (0, HWp - HW))) if HWp != HW else x3
    vmem_limit = int(min(max(usage * 5 // 4 + (2 << 20), 16 << 20), cap))
    grid = (C // c_tile, HWp // hw_tile)

    stats = pl.pallas_call(
        _bn_stats_kernel,
        out_shape=jax.ShapeDtypeStruct((C, 2), jnp.float32),
        grid_spec=pltpu.PrefetchScalarGridSpec(
            num_scalar_prefetch=0,
            grid=grid,
            in_specs=[pl.BlockSpec((B, c_tile, hw_tile), lambda c, h: (0, c, h))],
            out_specs=pl.BlockSpec((c_tile, 2), lambda c, h: (c, 0)),
            scratch_shapes=[pltpu.VMEM((c_tile, hw_tile), jnp.float32)],
        ),
        compiler_params=pltpu.CompilerParams(
            dimension_semantics=("parallel", "arbitrary"),
            vmem_limit_bytes=vmem_limit,
        ),
        cost_estimate=pl.CostEstimate(
            flops=3 * B * C * HWp,
            transcendentals=0,
            bytes_accessed=B * C * HWp * x_bytes + C * 2 * 4,
        ),
    )(x3p)

    # Finalize per-(B, C) scale/shift in XLA (tiny C-length math); zero padding adds 0
    # to both raw sums, so only the true element count matters here.
    mean = stats[:, 0] * inv_n                                              # (C,)
    var = jnp.maximum(stats[:, 1] * inv_n - mean * mean, 0.0)               # biased var
    inv_std = jax.lax.rsqrt(var + EPS)
    scale = (1.0 + gamma) * inv_std[None, :]                                # (B, C)
    shift = beta - mean[None, :] * scale                                    # (B, C)
    ssh = jnp.stack([scale, shift], axis=-1)                                # (B, C, 2) f32

    out3 = pl.pallas_call(
        _bn_apply_kernel,
        out_shape=jax.ShapeDtypeStruct((B, C, HWp), x.dtype),
        grid_spec=pltpu.PrefetchScalarGridSpec(
            num_scalar_prefetch=0,
            grid=grid,
            in_specs=[
                pl.BlockSpec((B, c_tile, hw_tile), lambda c, h: (0, c, h)),
                pl.BlockSpec((B, c_tile, 2), lambda c, h: (0, c, 0)),
            ],
            out_specs=pl.BlockSpec((B, c_tile, hw_tile), lambda c, h: (0, c, h)),
        ),
        compiler_params=pltpu.CompilerParams(
            dimension_semantics=("parallel", "parallel"),
            vmem_limit_bytes=vmem_limit,
        ),
        cost_estimate=pl.CostEstimate(
            flops=2 * B * C * HWp,
            transcendentals=0,
            bytes_accessed=B * C * HWp * (x_bytes + o_bytes) + B * C * 2 * 4,
        ),
    )(x3p, ssh)
    out3 = out3[:, :, :HW] if HWp != HW else out3
    return out3.reshape(B, C, H, W)


def _reference(x, y, w_gamma, w_beta):
    # Pure-JAX reference with identical semantics.
    mean = jnp.mean(x, axis=(0, 2, 3), keepdims=True)
    var = jnp.mean((x - mean) ** 2, axis=(0, 2, 3), keepdims=True)
    xn = (x - mean) / jnp.sqrt(var + EPS)
    gamma = (y @ w_gamma.T)[:, :, None, None]
    beta = (y @ w_beta.T)[:, :, None, None]
    return xn + gamma * xn + beta


if __name__ == "__main__":
    key = jax.random.PRNGKey(0)

    def _make_inputs(k, B, C, H, W, E):
        kx, ky, kg, kb = jax.random.split(k, 4)
        x = jax.random.normal(kx, (B, C, H, W), dtype=jnp.float32)
        y = jax.random.normal(ky, (B, E), dtype=jnp.float32)
        limit = (6.0 / (C + E)) ** 0.5          # xavier-uniform-style bound
        w_gamma = jax.random.uniform(kg, (C, E), jnp.float32, -limit, limit)
        w_beta = jax.random.uniform(kb, (C, E), jnp.float32, -limit, limit)
        return x, y, w_gamma, w_beta

    configs = [
        # (B, C, H, W, E, force_two_pass)
        (2, 4, 16, 16, 8, False),   # single-pass path, lane-dense HW
        (2, 4, 7, 7, 8, False),     # single-pass path, HW padded to a lane multiple
        (2, 8, 16, 16, 8, True),    # two-pass (stats + apply) path exercised at small shape
    ]
    keys = jax.random.split(key, len(configs))
    for k, (B, C, H, W, E, two_pass) in zip(keys, configs):
        x, y, w_gamma, w_beta = _make_inputs(k, B, C, H, W, E)
        out = conditional_batchnorm2d(x, y, w_gamma, w_beta, force_two_pass=two_pass)
        out = jax.block_until_ready(out)
        ref = _reference(x, y, w_gamma, w_beta)
        assert out.shape == (B, C, H, W)
        assert jnp.allclose(out, ref, atol=1e-4, rtol=1e-4), (
            f"mismatch vs reference for shape {(B, C, H, W)}, two_pass={two_pass}")

    print("KERNEL_OK")
</pallas_src>

<mosaic_0001>
module attributes {stable_mosaic.version = 11 : i64} {
  func.func @_cond_bn_single_pass_kernel(%arg0: i32, %arg1: memref<2x4x256xf32, #tpu.memory_space<vmem>>, %arg2: memref<2x4x2xf32, #tpu.memory_space<vmem>>, %arg3: memref<2x4x256xf32, #tpu.memory_space<vmem>>, %arg4: memref<4x256xf32, #tpu.memory_space<vmem>>) attributes {dimension_semantics = [#tpu.dimension_semantics<parallel>], iteration_bounds = array<i64: 1>, scalar_prefetch = 0 : i64, scratch_operands = 1 : i64, tpu.core_type = #tpu.core_type<tc>, window_params = [{transform_indices = @transform_0, window_bounds = array<i64: 2, 4, 256>}, {transform_indices = @transform_1, window_bounds = array<i64: 2, 4, 2>}, {transform_indices = @transform_2, window_bounds = array<i64: 2, 4, 256>}]} {
    %cst = arith.constant 0.000000e+00 : f32
    %0 = vector.broadcast %cst : f32 to vector<4x256xf32>
    %c0 = arith.constant 0 : index
    %c0_0 = arith.constant 0 : index
    %1 = vector.load %arg4[%c0, %c0_0] : memref<4x256xf32, #tpu.memory_space<vmem>>, vector<4x256xf32>
    tpu.vector_store %arg4[%c0, %c0_0], %0 {strides = array<i32>} : memref<4x256xf32, #tpu.memory_space<vmem>>, vector<4x256xf32>,
    %c0_i32 = arith.constant 0 : i32
    %c2_i32 = arith.constant 2 : i32
    %2 = arith.addi %c0_i32, %c2_i32 : i32
    %c1_i32 = arith.constant 1 : i32
    scf.for %arg5 = %c0_i32 to %2 step %c1_i32  : i32 {
      %c0_23 = arith.constant 0 : index
      %c0_24 = arith.constant 0 : index
      %22 = vector.load %arg4[%c0_23, %c0_24] : memref<4x256xf32, #tpu.memory_space<vmem>>, vector<4x256xf32>
      %23 = arith.index_cast %arg5 : i32 to index
      %c0_25 = arith.constant 0 : index
      %c0_26 = arith.constant 0 : index
      %24 = vector.load %arg1[%23, %c0_25, %c0_26] : memref<2x4x256xf32, #tpu.memory_space<vmem>>, vector<1x4x256xf32>
      %25 = vector.shape_cast %24 : vector<1x4x256xf32> to vector<4x256xf32>
      %26 = arith.addf %22, %25 : vector<4x256xf32>
      %c0_27 = arith.constant 0 : index
      %c0_28 = arith.constant 0 : index
      %27 = vector.load %arg4[%c0_27, %c0_28] : memref<4x256xf32, #tpu.memory_space<vmem>>, vector<4x256xf32>
      tpu.vector_store %arg4[%c0_27, %c0_28], %26 {strides = array<i32>} : memref<4x256xf32, #tpu.memory_space<vmem>>, vector<4x256xf32>,
    }
    %c2_i32_1 = arith.constant 2 : i32
    %c0_2 = arith.constant 0 : index
    %c0_3 = arith.constant 0 : index
    %3 = vector.load %arg4[%c0_2, %c0_3] : memref<4x256xf32, #tpu.memory_space<vmem>>, vector<4x256xf32>
    %cst_4 = arith.constant dense<0.000000e+00> : vector<4xf32>
    %4 = vector.multi_reduction <add>, %3, %cst_4 [1] : vector<4x256xf32> to vector<4xf32>
    %5 = vector.shape_cast %4 : vector<4xf32> to vector<4x1xf32>
    %cst_5 = arith.constant 0.001953125 : f32
    %6 = vector.broadcast %cst_5 : f32 to vector<4x1xf32>
    %7 = arith.mulf %5, %6 : vector<4x1xf32>
    %cst_6 = arith.constant 0.000000e+00 : f32
    %8 = vector.broadcast %cst_6 : f32 to vector<4x256xf32>
    %c0_7 = arith.constant 0 : index
    %c0_8 = arith.constant 0 : index
    %9 = vector.load %arg4[%c0_7, %c0_8] : memref<4x256xf32, #tpu.memory_space<vmem>>, vector<4x256xf32>
    tpu.vector_store %arg4[%c0_7, %c0_8], %8 {strides = array<i32>} : memref<4x256xf32, #tpu.memory_space<vmem>>, vector<4x256xf32>,
    %c0_i32_9 = arith.constant 0 : i32
    %c2_i32_10 = arith.constant 2 : i32
    %10 = arith.addi %c0_i32_9, %c2_i32_10 : i32
    %c1_i32_11 = arith.constant 1 : i32
    scf.for %arg5 = %c0_i32_9 to %10 step %c1_i32_11  : i32 {
      %22 = arith.index_cast %arg5 : i32 to index
      %c0_23 = arith.constant 0 : index
      %c0_24 = arith.constant 0 : index
      %23 = vector.load %arg1[%22, %c0_23, %c0_24] : memref<2x4x256xf32, #tpu.memory_space<vmem>>, vector<1x4x256xf32>
      %24 = vector.shape_cast %23 : vector<1x4x256xf32> to vector<4x256xf32>
      %25 = vector.broadcast %7 : vector<4x1xf32> to vector<4x256xf32>
      %26 = arith.subf %24, %25 : vector<4x256xf32>
      %c0_25 = arith.constant 0 : index
      %c0_26 = arith.constant 0 : index
      %27 = vector.load %arg4[%c0_25, %c0_26] : memref<4x256xf32, #tpu.memory_space<vmem>>, vector<4x256xf32>
      %28 = arith.mulf %26, %26 : vector<4x256xf32>
      %29 = arith.addf %27, %28 : vector<4x256xf32>
      %c0_27 = arith.constant 0 : index
      %c0_28 = arith.constant 0 : index
      %30 = vector.load %arg4[%c0_27, %c0_28] : memref<4x256xf32, #tpu.memory_space<vmem>>, vector<4x256xf32>
      tpu.vector_store %arg4[%c0_27, %c0_28], %29 {strides = array<i32>} : memref<4x256xf32, #tpu.memory_space<vmem>>, vector<4x256xf32>,
    }
    %c2_i32_12 = arith.constant 2 : i32
    %c0_13 = arith.constant 0 : index
    %c0_14 = arith.constant 0 : index
    %11 = vector.load %arg4[%c0_13, %c0_14] : memref<4x256xf32, #tpu.memory_space<vmem>>, vector<4x256xf32>
    %cst_15 = arith.constant dense<0.000000e+00> : vector<4xf32>
    %12 = vector.multi_reduction <add>, %11, %cst_15 [1] : vector<4x256xf32> to vector<4xf32>
    %13 = vector.shape_cast %12 : vector<4xf32> to vector<4x1xf32>
    %cst_16 = arith.constant 0.001953125 : f32
    %14 = vector.broadcast %cst_16 : f32 to vector<4x1xf32>
    %15 = arith.mulf %13, %14 : vector<4x1xf32>
    %cst_17 = arith.constant 0.000000e+00 : f32
    %16 = vector.broadcast %cst_17 : f32 to vector<4x1xf32>
    %17 = arith.maximumf %15, %16 : vector<4x1xf32>
    %cst_18 = arith.constant 9.99999974E-6 : f32
    %18 = vector.broadcast %cst_18 : f32 to vector<4x1xf32>
    %19 = arith.addf %17, %18 : vector<4x1xf32>
    %20 = math.rsqrt %19 : vector<4x1xf32>
    %c0_i32_19 = arith.constant 0 : i32
    %c2_i32_20 = arith.constant 2 : i32
    %21 = arith.addi %c0_i32_19, %c2_i32_20 : i32
    %c1_i32_21 = arith.constant 1 : i32
    scf.for %arg5 = %c0_i32_19 to %21 step %c1_i32_21  : i32 {
      %22 = arith.index_cast %arg5 : i32 to index
      %c0_23 = arith.constant 0 : index
      %c0_24 = arith.constant 0 : index
      %23 = vector.load %arg2[%22, %c0_23, %c0_24] : memref<2x4x2xf32, #tpu.memory_space<vmem>>, vector<1x4x2xf32>
      %24 = vector.shape_cast %23 : vector<1x4x2xf32> to vector<4x2xf32>
      %25 = vector.extract_strided_slice %24 {offsets = [0, 0], sizes = [4, 1], strides = [1, 1]} : vector<4x2xf32> to vector<4x1xf32>
      %cst_25 = arith.constant 1.000000e+00 : f32
      %26 = vector.broadcast %cst_25 : f32 to vector<4x1xf32>
      %27 = arith.addf %26, %25 : vector<4x1xf32>
      %28 = arith.mulf %27, %20 : vector<4x1xf32>
      %29 = vector.extract_strided_slice %24 {offsets = [0, 1], sizes = [4, 1], strides = [1, 1]} : vector<4x2xf32> to vector<4x1xf32>
      %30 = arith.mulf %7, %28 : vector<4x1xf32>
      %31 = arith.subf %29, %30 : vector<4x1xf32>
      %32 = arith.index_cast %arg5 : i32 to index
      %c0_26 = arith.constant 0 : index
      %c0_27 = arith.constant 0 : index
      %33 = vector.load %arg1[%32, %c0_26, %c0_27] : memref<2x4x256xf32, #tpu.memory_space<vmem>>, vector<1x4x256xf32>
      %34 = vector.shape_cast %33 : vector<1x4x256xf32> to vector<4x256xf32>
      %35 = vector.broadcast %28 : vector<4x1xf32> to vector<4x256xf32>
      %36 = arith.mulf %34, %35 : vector<4x256xf32>
      %37 = vector.broadcast %31 : vector<4x1xf32> to vector<4x256xf32>
      %38 = arith.addf %36, %37 : vector<4x256xf32>
      %39 = arith.index_cast %arg5 : i32 to index
      %c0_28 = arith.constant 0 : index
      %c0_29 = arith.constant 0 : index
      %40 = vector.load %arg3[%39, %c0_28, %c0_29] : memref<2x4x256xf32, #tpu.memory_space<vmem>>, vector<1x4x256xf32>
      %41 = vector.shape_cast %40 : vector<1x4x256xf32> to vector<4x256xf32>
      %42 = vector.shape_cast %38 : vector<4x256xf32> to vector<1x4x256xf32>
      tpu.vector_store %arg3[%39, %c0_28, %c0_29], %42 {strides = array<i32>} : memref<2x4x256xf32, #tpu.memory_space<vmem>>, vector<1x4x256xf32>,
    }
    %c2_i32_22 = arith.constant 2 : i32
    return
  }
  func.func @transform_0(%arg0: i32) -> (i32, i32, i32) {
    %c0_i32 = arith.constant 0 : i32
    %c0_i32_0 = arith.constant 0 : i32
    %c0_i32_1 = arith.constant 0 : i32
    return %c0_i32, %arg0, %c0_i32_0 : i32, i32, i32
  }
  func.func @transform_1(%arg0: i32) -> (i32, i32, i32) {
    %c0_i32 = arith.constant 0 : i32
    %c0_i32_0 = arith.constant 0 : i32
    %c0_i32_1 = arith.constant 0 : i32
    return %c0_i32, %arg0, %c0_i32_0 : i32, i32, i32
  }
  func.func @transform_2(%arg0: i32) -> (i32, i32, i32) {
    %c0_i32 = arith.constant 0 : i32
    %c0_i32_0 = arith.constant 0 : i32
    %c0_i32_1 = arith.constant 0 : i32
    return %c0_i32, %arg0, %c0_i32_0 : i32, i32, i32
  }
}

</mosaic_0001>

<bundles_post_ra>
// kernel: tpu_custom_call.1
= control target key start
LH: loop header
LB: loop body
LE: loop exit
PB: predicated region body
PF: predicated region fallthrough
CT: control target
= control target key end

     0   :  { %7 = vsyncpa [#allocation4], 0  ;;  %s380_s0 = inlined_call_operand.hbm [shape: f32[2,4,256], index: 0, kind: input, shape index: {}]   ;;  %s381_s1 = inlined_call_operand.vmem [shape: f32[2,4,2], index: 1, kind: input, shape index: {}]   ;;  %s382_s2 = inlined_call_operand.hbm [shape: f32[2,4,256], index: 2, kind: output, shape index: {}]  }
   0x1   :  { %8 = vsyncpa [#allocation5], 0  ;;  %s305_s9 = smov [#allocation3]   ;;  %s233_s13 = scalar_lea.hbm %s380_s0, 256 }
   0x2   :  { %s14_s10 = sshll.u32 %s305_s9, 4  ;;  %p234_p0 = scmp.ne.s32.totalorder %s380_s0, %s233_s13  ;;  %s15_s10 = int_to_ptr.vmem [resolvable:$true] %s14_s10 }
   0x3   :  { %p237_p1 = scmp.lt.u32.totalorder %s233_s13, %s380_s0 }
   0x5   :  { %p239_p2 = pnand %p237_p1, %p234_p0 }
   0x7   :  { %242 = shalt.err (!%p239_p2)
}
   0x8   :  { %s243_s18 = scalar_lea.vmem %s15_s10, 256  ;;  %p248_p4 = scmp.lt.s32.totalorder %s15_s10, %s15_s10 }
   0x9   :  { %p244_p3 = scmp.ne.s32.totalorder %s15_s10, %s243_s18  ;;  %p249_p5 = scmp.lt.s32.totalorder %s243_s18, %s243_s18 }
   0xb   :  { %p250_p6 = por %p249_p5, %p248_p4 }
   0xd   :  { %p251_p7 = pnand %p250_p6, %p244_p3 }
   0xf   :  { %254 = shalt.err (!%p251_p7)
}
  0x10   :  { %s306_s19 = smov 128   ;;  %s307_s20 = smov 8  }
  0x11   :  { %20 = dma.hbm_to_vmem [thread:$0]  %s380_s0, 256, %s15_s10, [#allocation4], %s306_s19, %s306_s19, %s307_s20  }
  0x12   :  { %289 = dma.done.wait [#allocation4], 256  }
  0x13   :  { %290 = vsyncadd [#allocation4], 4294967040  ;;  %v308_v0 = vmov 0.0   ;;  %s293_s23 = smov 0  }
  0x14   :  { %26 = vst [vmem:[#allocation2] sm:$0xff] %v308_v0 }
  0x15 LB: > { %s189_s24 = sshll.u32 %s295_s23, 3  ;;  %s32_s23 = sadd.s32 1, %s295_s23   ;;  %s295_s23 = sphi %s293_s23, %s32_s23  }
  0x16   : > { %s36_s25 = scalar_lea.vmem [#allocation3], %s189_s24  ;;  %p29_p8 = scmp.ge.s32.totalorder %s32_s23, 2  }
  0x17   : > { %v37_v2 = vld [vmem:[%s36_s25] sm:$0xff]  ;;  %vm44_vm0 = vcmask (%p29_p8), 1043456   ;;  %s297_s0 = smov (%p29_p8), 0  }
  0x18   :  { %31 = sbr.rel (!%p29_p8) target bundleno = 21 (0x15), region = 58 }
  0x1b   : > { %v33_v1 = vld [vmem:[#allocation2] sm:$0xff] }
  0x1c   : > { %v38_v3 = vadd.f32 %v37_v2, %v33_v1 }
  0x1e   : > { %39 = vst [vmem:[#allocation2] sm:$0xff] %v38_v3 }
  0x25   :  { %v40_v4 = vld [vmem:[#allocation2] sm:$0xff] }
  0x26   :  { %v42_v5 = vcombine.high %v40_v4, %v40_v4  ;;  %v45_v6 = vsel %vm44_vm0, %v40_v4, 0.0  ;;  %51 = vst [vmem:[#allocation2] sm:$0xff] %v308_v0 }
  0x28   :  { %v46_v7 = vsel %vm44_vm0, %v42_v5, 0.0 }
  0x29   :  { %v47_v8 = vadd.f32 %v46_v7, %v45_v6 }
  0x2b   :  { %48 = vadd.xlane.f32.xlu0 %v47_v8 }
  0xb8   :  { %v49_v9 = vpop.xlane.xlu0 %48 }
  0xb9   :  { %v346_v10 = vmul.f32 0.001953125, %v49_v9 }
  0xba LB: > { %v66_v11 = vlaneseq  ;;  %v309_v12 = vmov 839922192   ;;  %s190_s26 = sshll.u32 %s299_s0, 3  ;;  %v72_v20 = vld [vmem:[#allocation2] sm:$0xff]  ;;  %s57_s0 = sadd.s32 1, %s299_s0   ;;  %s299_s0 = sphi %s297_s0, %s57_s0  }
  0xbb   : > { %v64_v13 = vunpack.c.l.s4 %v309_v12  ;;  %s60_s27 = scalar_lea.vmem [#allocation3], %s190_s26  ;;  %p54_p9 = scmp.ge.s32.totalorder %s57_s0, 2  }
  0xbc   : > { %v67_v14 = vshrl.u32 %v66_v11, 7  ;;  %v61_v17 = vld [vmem:[%s60_s27] sm:$0xff]  ;;  %s351_s28 = smov (%p54_p9), 0  }
  0xbd   : > { %v65_v15 = vunpack.c.0.s8 %v64_v13 }
  0xbf   : > { %v68_v16 = vsub.s32 %v65_v15, %v67_v14 }
  0xc1   : > { %v69_v18 = vrot.slane %v346_v10, %v68_v16 }
  0xc3   : > { %v71_v19 = vsub.f32 %v61_v17, %v69_v18  ;;  %56 = sbr.rel (!%p54_p9) target bundleno = 186 (0xba), region = 69 }
  0xc5   : > { %v73_v21 = vmul.f32 %v71_v19, %v71_v19 }
  0xc7   : > { %v74_v22 = vadd.f32 %v73_v21, %v72_v20 }
  0xc9   : > { %75 = vst [vmem:[#allocation2] sm:$0xff] %v74_v22 }
  0xd0   :  { %v76_v23 = vld [vmem:[#allocation2] sm:$0xff] }
  0xd1   :  { %v78_v24 = vcombine.high %v76_v23, %v76_v23  ;;  %v80_v25 = vsel %vm44_vm0, %v76_v23, 0.0 }
  0xd3   :  { %v81_v26 = vsel %vm44_vm0, %v78_v24, 0.0 }
  0xd4   :  { %v82_v27 = vadd.f32 %v81_v26, %v80_v25 }
  0xd6   :  { %83 = vadd.xlane.f32.xlu0 %v82_v27 }
 0x163   :  { %v84_v28 = vpop.xlane.xlu0 %83 }
 0x164   :  { %v85_v29 = vmul.f32 0.001953125, %v84_v28 }
 0x166   :  { %v86_v30 = vmax.f32 %v85_v29, 0.0 }
 0x168   :  { %v87_v31 = vadd.f32 1e-05, %v86_v30 }
 0x16a   :  { %228 = vrsqrt.f32 %v87_v31 }
 0x174   :  { %v229_v32 = vpop.eup %228 }
 0x175 LB: > { %v310_v33 = vmov 0   ;;  %v311_v34 = vmov 1   ;;  %s185_s29 = sshll.u32 %s303_s28, 2  ;;  %s312_s5 = smov 1   ;;  %s303_s28 = sphi %s351_s28, %s94_s28  }
 0x176   : > { %230 = vset.pattern.permute.xlu0 %v310_v33  ;;  %231 = vset.pattern.permute.xlu1 %v311_v34  ;;  %s96_s4 = scalar_lea.vmem %s381_s1, %s185_s29  ;;  %s191_s6 = sshll.u32 %s303_s28, 3 }
 0x177   : > { %v97_v35 = vld [vmem:[%s96_s4] sm:$0xf]  ;;  %s108_s7 = scalar_lea.vmem [#allocation3], %s191_s6  ;;  %s137_s8 = scalar_lea.vmem [#allocation6], %s191_s6 }
 0x178   : > { %v98_v36 = vadd.f32 1.0, %v97_v35  ;;  %v109_v43 = vld [vmem:[%s108_s7] sm:$0xff]  ;;  %s94_s28 = sadd.s32 1, %s303_s28  }
 0x179   : > { %p91_p10 = scmp.ge.s32.totalorder %s94_s28, 2  }
 0x17a   : > { %v99_v37 = vmul.f32 %v229_v32, %v98_v36  ;;  %s313_s9 = smov (%p91_p10), [#allocation6]  }
 0x17b   :  { %s144_s10 = sshll.u32 (%p91_p10), %s313_s9, 4  ;;  %s145_s10 = int_to_ptr.vmem [resolvable:$true] %s144_s10 }
 0x17c   : > { %v100_v38 = vmul.f32 %v99_v37, %v346_v10  ;;  %s255_s11 = scalar_lea.vmem (%p91_p10), %s145_s10, 256  ;;  %p260_p12 = scmp.lt.s32.totalorder (%p91_p10), %s145_s10, %s145_s10 }
 0x17d   :  { %p256_p11 = scmp.ne.s32.totalorder (%p91_p10), %s145_s10, %s255_s11  ;;  %p261_p13 = scmp.lt.s32.totalorder (%p91_p10), %s255_s11, %s255_s11 }
 0x17e   : > { %102 = vrot.lane.b32.xlu0 %v100_v38, %s312_s5 }
 0x17f   :  { %p262_p0 = por (%p91_p10), %p261_p13, %p260_p12 }
 0x181   :  { %p263_p1 = pnand (%p91_p10), %p262_p0, %p256_p11 }
 0x182   : > { %112 = vperm.xlu0 %230, %v99_v37  }
 0x186   : > { %232 = vset.pattern.permute.xlu0 %v311_v34 }
 0x1f0   : > { %v103_v39 = vpop.permute.xlu0 %102 }
 0x1f1   : > { %v105_v40 = vsub.f32 %v97_v35, %v103_v39 }
 0x1f3   : > { %125 = vperm.xlu1 %231, %v105_v40  }
 0x201   : > { %v113_v41 = vpop.permute.xlu0 %112 }
 0x202   : > { %v120_v42 = vrot.slane %v113_v41, %v68_v16 }
 0x204   : > { %v122_v44 = vmul.f32 %v120_v42, %v109_v43 }
 0x271   :  { %93 = sbr.rel (!%p91_p10) target bundleno = 373 (0x175), region = 80 }
 0x272   : > { %v126_v45 = vpop.permute.xlu1 %125 }
 0x273   : > { %v133_v46 = vrot.slane %v126_v45, %v68_v16 }
 0x275   : > { %v135_v47 = vadd.f32 %v133_v46, %v122_v44 }
 0x277   : > { %138 = vst [vmem:[%s137_s8] sm:$0xff] %v135_v47 }
 0x278   :  { %266 = shalt.err (!%p263_p1)
}
 0x279   :  { %s267_s14 = scalar_lea.hbm %s382_s2, 256 }
 0x27a   :  { %p268_p2 = scmp.ne.s32.totalorder %s382_s2, %s267_s14  ;;  %p271_p3 = scmp.lt.u32.totalorder %s267_s14, %s382_s2 }
 0x27c   :  { %p273_p4 = pnand %p271_p3, %p268_p2 }
 0x27e   :  { %276 = shalt.err (!%p273_p4)
}
 0x27f   :  { %150 = dma.vmem_to_hbm [thread:$0]  %s145_s10, 256, %s382_s2, [#allocation5], %s306_s19, %s306_s19, %s307_s20  }
 0x280   :  { %291 = dma.done.wait [#allocation5], 256  }
 0x281   :  { %292 = vsyncadd [#allocation5], 4294967040 }
 0x282   :  { %154 = vsyncpa [#allocation4], 1 }
 0x283   :  { %155 = vsyncpa [#allocation5], 1 }

</bundles_post_ra>
